<compile_context>
chip_gen: v6e
topology: v6e:2x2x1
jax: 0.10.0
libtpu: 0.0.40
codegen_flags: <defaults>
</compile_context>

<pallas_src>
import functools
import math

import jax
import jax.numpy as jnp
from jax.experimental import pallas as pl
from jax.experimental.pallas import tpu as pltpu


EPS = 1e-5
VMEM_LIMIT_BYTES = 32 * 1024 * 1024   # explicit scoped-VMEM budget (safe on v5e/v6e/v7x)


def _round_up(n, m):
    return ((n + m - 1) // m) * m


# ------------------------------- kernel --------------------------------------

def _bias_free_ln_kernel(x_ref, w_ref, o_ref, *, eps):
    # x_ref: (TM, C); normalize over the last axis.
    x = x_ref[...].astype(jnp.float32)
    w = w_ref[...].astype(jnp.float32)                   # (1, C)
    # Single-pass variance in f32: var = E[x^2] - E[x]^2 (clamped for safety).
    mean = jnp.mean(x, axis=-1, keepdims=True)
    mean_sq = jnp.mean(x * x, axis=-1, keepdims=True)
    var = jnp.maximum(mean_sq - mean * mean, 0.0)        # (TM, 1)
    inv = jax.lax.rsqrt(var + eps)                       # one EUP op, own VLIW slot
    o_ref[...] = (x * inv * w).astype(o_ref.dtype)


# ---------------------------- tile-size choice --------------------------------

def _choose_block_rows(m, c, itemsize, vmem_limit_bytes):
    """Rows per block: ~1 MiB tiles, VMEM-budgeted, >=2 grid steps when possible."""
    padded_c = _round_up(c, 128)                         # lane padding of the VMEM window
    bytes_per_row = padded_c * max(itemsize, 4)          # conservative (f32 work copies)
    target_tile = 1 << 20                                # ~1 MiB -> near HBM roofline
    tm = max(1, target_tile // bytes_per_row)
    # double-buffered input + output windows must stay well under the scoped limit
    tm = min(tm, max(1, (vmem_limit_bytes // 2) // (4 * bytes_per_row)))
    # keep at least 2 grid steps so ("parallel",) can shard across both TensorCores
    if m > 8:
        tm = min(tm, pl.cdiv(m, 2))
    if tm >= m:
        return m                                         # single full block (always legal)
    return max(8, (tm // 8) * 8)                         # second-minor dim: multiple of 8


# ------------------------------- wrapper --------------------------------------

def bias_free_layernorm(x, weight, eps=EPS):
    """out = x / sqrt(var(x, -1, unbiased=False) + eps) * weight  (over last dim)."""
    orig_shape = x.shape
    c = orig_shape[-1]
    m = math.prod(orig_shape[:-1]) if len(orig_shape) > 1 else 1

    xf = x.reshape(m, c)                                 # free row-major reshape
    w2 = weight.reshape(1, c)

    tm = _choose_block_rows(m, c, jnp.dtype(x.dtype).itemsize, VMEM_LIMIT_BYTES)
    grid = (pl.cdiv(m, tm),)                             # ragged tail handled by Pallas

    out = pl.pallas_call(
        functools.partial(_bias_free_ln_kernel, eps=eps),
        out_shape=jax.ShapeDtypeStruct((m, c), x.dtype),
        grid=grid,
        in_specs=[
            pl.BlockSpec((tm, c), lambda i: (i, 0)),     # data tile (rows x full C)
            pl.BlockSpec((1, c), lambda i: (0, 0)),      # weight, resident across steps
        ],
        out_specs=pl.BlockSpec((tm, c), lambda i: (i, 0)),
        compiler_params=pltpu.CompilerParams(
            dimension_semantics=("parallel",),           # independent row tiles -> megacore
            vmem_limit_bytes=VMEM_LIMIT_BYTES,
        ),
    )(xf, w2)

    return out.reshape(orig_shape)


# ------------------------------ reference ------------------------------------

def bias_free_layernorm_reference(x, weight, eps=EPS):
    xf = x.astype(jnp.float32)
    sigma = jnp.var(xf, axis=-1, keepdims=True)          # ddof=0 == unbiased=False
    return (xf / jnp.sqrt(sigma + eps) * weight.astype(jnp.float32)).astype(x.dtype)


# --------------------------------- main ---------------------------------------

if __name__ == "__main__":
    key = jax.random.PRNGKey(0)
    k1, k2, k3, k4, k5, k6 = jax.random.split(key, 6)

    cases = []
    # Restormer-style tokens (b, h*w, c) with small, non-128-multiple c.
    x1 = jax.random.normal(k1, (2, 16 * 16, 48), jnp.float32)
    w1 = 1.0 + 0.1 * jax.random.normal(k2, (48,), jnp.float32)
    cases.append((x1, w1))
    # Lane-dense hidden dim (multiple of 128).
    x2 = jax.random.normal(k3, (2, 8, 128), jnp.float32)
    w2 = 1.0 + 0.1 * jax.random.normal(k4, (128,), jnp.float32)
    cases.append((x2, w2))
    # Ragged row count -> exercises the cdiv partial final block.
    x3 = jax.random.normal(k5, (3, 7, 48), jnp.float32)
    w3 = 1.0 + 0.1 * jax.random.normal(k6, (48,), jnp.float32)
    cases.append((x3, w3))

    fwd = jax.jit(bias_free_layernorm)

    ok = True
    for x, w in cases:
        out = jax.block_until_ready(fwd(x, w))
        ref = bias_free_layernorm_reference(x, w)
        assert out.shape == x.shape, (out.shape, x.shape)
        assert bool(jnp.all(jnp.isfinite(out)))
        ok &= bool(jnp.allclose(out, ref, atol=1e-4, rtol=1e-4))

    assert ok, "Pallas output does not match reference"
    print("KERNEL_OK")
</pallas_src>

<mosaic_0001>
module attributes {stable_mosaic.version = 11 : i64} {
  func.func @_bias_free_ln_kernel(%arg0: i32, %arg1: memref<256x48xf32, #tpu.memory_space<vmem>>, %arg2: memref<1x48xf32, #tpu.memory_space<vmem>>, %arg3: memref<256x48xf32, #tpu.memory_space<vmem>>) attributes {dimension_semantics = [#tpu.dimension_semantics<parallel>], iteration_bounds = array<i64: 2>, scalar_prefetch = 0 : i64, scratch_operands = 0 : i64, tpu.core_type = #tpu.core_type<tc>, window_params = [{transform_indices = @transform_0, window_bounds = array<i64: 256, 48>}, {pipeline_mode = #tpu.pipeline_mode<synchronous>, transform_indices = @transform_1, window_bounds = array<i64: 1, 48>}, {transform_indices = @transform_2, window_bounds = array<i64: 256, 48>}]} {
    %c0 = arith.constant 0 : index
    %c0_0 = arith.constant 0 : index
    %0 = vector.load %arg1[%c0, %c0_0] : memref<256x48xf32, #tpu.memory_space<vmem>>, vector<256x48xf32>
    %c0_1 = arith.constant 0 : index
    %c0_2 = arith.constant 0 : index
    %1 = vector.load %arg2[%c0_1, %c0_2] : memref<1x48xf32, #tpu.memory_space<vmem>>, vector<1x48xf32>
    %cst = arith.constant dense<0.000000e+00> : vector<256xf32>
    %2 = vector.multi_reduction <add>, %0, %cst [1] : vector<256x48xf32> to vector<256xf32>
    %3 = vector.shape_cast %2 : vector<256xf32> to vector<256x1xf32>
    %cst_3 = arith.constant 4.800000e+01 : f32
    %4 = vector.broadcast %cst_3 : f32 to vector<256x1xf32>
    %5 = arith.divf %3, %4 : vector<256x1xf32>
    %6 = arith.mulf %0, %0 : vector<256x48xf32>
    %cst_4 = arith.constant dense<0.000000e+00> : vector<256xf32>
    %7 = vector.multi_reduction <add>, %6, %cst_4 [1] : vector<256x48xf32> to vector<256xf32>
    %8 = vector.shape_cast %7 : vector<256xf32> to vector<256x1xf32>
    %cst_5 = arith.constant 4.800000e+01 : f32
    %9 = vector.broadcast %cst_5 : f32 to vector<256x1xf32>
    %10 = arith.divf %8, %9 : vector<256x1xf32>
    %11 = arith.mulf %5, %5 : vector<256x1xf32>
    %12 = arith.subf %10, %11 : vector<256x1xf32>
    %cst_6 = arith.constant 0.000000e+00 : f32
    %13 = vector.broadcast %cst_6 : f32 to vector<256x1xf32>
    %14 = arith.maximumf %12, %13 : vector<256x1xf32>
    %cst_7 = arith.constant 9.99999974E-6 : f32
    %15 = vector.broadcast %cst_7 : f32 to vector<256x1xf32>
    %16 = arith.addf %14, %15 : vector<256x1xf32>
    %17 = math.rsqrt %16 : vector<256x1xf32>
    %18 = vector.broadcast %17 : vector<256x1xf32> to vector<256x48xf32>
    %19 = arith.mulf %0, %18 : vector<256x48xf32>
    %20 = vector.broadcast %1 : vector<1x48xf32> to vector<256x48xf32>
    %21 = arith.mulf %19, %20 : vector<256x48xf32>
    %c0_8 = arith.constant 0 : index
    %c0_9 = arith.constant 0 : index
    %22 = vector.load %arg3[%c0_8, %c0_9] : memref<256x48xf32, #tpu.memory_space<vmem>>, vector<256x48xf32>
    tpu.vector_store %arg3[%c0_8, %c0_9], %21 {strides = array<i32>} : memref<256x48xf32, #tpu.memory_space<vmem>>, vector<256x48xf32>,
    return
  }
  func.func @transform_0(%arg0: i32) -> (i32, i32) {
    %c0_i32 = arith.constant 0 : i32
    %c0_i32_0 = arith.constant 0 : i32
    return %arg0, %c0_i32 : i32, i32
  }
  func.func @transform_1(%arg0: i32) -> (i32, i32) {
    %c0_i32 = arith.constant 0 : i32
    %c0_i32_0 = arith.constant 0 : i32
    %c0_i32_1 = arith.constant 0 : i32
    return %c0_i32, %c0_i32_0 : i32, i32
  }
  func.func @transform_2(%arg0: i32) -> (i32, i32) {
    %c0_i32 = arith.constant 0 : i32
    %c0_i32_0 = arith.constant 0 : i32
    return %arg0, %c0_i32 : i32, i32
  }
}

</mosaic_0001>

<bundles_post_ra>
// kernel: bias_free_layernorm.1
= control target key start
LH: loop header
LB: loop body
LE: loop exit
PB: predicated region body
PF: predicated region fallthrough
CT: control target
= control target key end

     0   :  { %s899_s9 = smov 0   ;;  %s1427_s0 = inlined_call_operand.vmem [shape: f32[512,48], index: 0, kind: input, shape index: {}]   ;;  %s1428_s1 = inlined_call_operand.vmem [shape: f32[1,48], index: 1, kind: input, shape index: {}]   ;;  %s1429_s2 = inlined_call_operand.vmem [shape: f32[512,48], index: 2, kind: output, shape index: {}]  }
   0x1 LB: > { %s788_s10 = sadd.s32 4294967295, %s882_s9   ;;  %p792_p0 = scmp.ge.s32.totalorder %s882_s9, 1  ;;  %s882_s9 = sphi %s899_s9, %s12_s9  }
   0x2   : > { %p113_p1 = scmp.lt.s32.totalorder %s882_s9, 3 }
   0x4   : > { %p114_p2 = pnand %p792_p0, %p113_p1 }
   0x6   : > { %117 = sbr.rel (%p114_p2) target bundleno = 309 (0x135), region = 28 }
   0xb   : > { %s793_s11 = sshll.u32 %s788_s10, 5  ;;  %vm180_vm0 = vcmask 392192  }
   0xc   : > { %p136_p3 = scmp.lt.s32.totalorder %s793_s11, 63 }
   0xe   : > { %s1483_s11 = smov (!%p136_p3, %s793_s11), 63 }
   0xf   : > { %s794_s12 = sshll.u32 %s1483_s11, 3 }
  0x10   : > { %s915_s15 = scalar_lea.vmem %s1427_s0, %s794_s12  ;;  %s1256_s20 = scalar_lea.vmem %s1429_s2, %s794_s12 }
  0x11   : > { %v918_v0 = vld [vmem:[%s915_s15 + $0x10] sm:$0xff]  ;;  %v921_v1 = vld [vmem:[%s915_s15] sm:$0xff]  ;;  %v924_v2 = vld [vmem:[%s915_s15 + $0x18] sm:$0xff] }
  0x12   : > { %v187_v3 = vsel %vm180_vm0, %v918_v0, 0.0  ;;  %v181_v4 = vsel %vm180_vm0, %v921_v1, 0.0  ;;  %v931_v5 = vld [vmem:[%s915_s15 + $0x8] sm:$0xff]  ;;  %v190_v6 = vsel %vm180_vm0, %v924_v2, 0.0  ;;  %v941_v9 = vld [vmem:[%s915_s15 + $0x20] sm:$0xff]  ;;  %v948_v12 = vld [vmem:[%s915_s15 + $0x38] sm:$0xff] }
  0x13   : > { %188 = vadd.xlane.f32.xlu1 %v187_v3  ;;  %182 = vadd.xlane.f32.xlu0 %v181_v4  ;;  %v184_v7 = vsel %vm180_vm0, %v931_v5, 0.0  ;;  %v938_v8 = vld [vmem:[%s915_s15 + $0x28] sm:$0xff]  ;;  %v193_v11 = vsel %vm180_vm0, %v941_v9, 0.0  ;;  %v951_v13 = vld [vmem:[%s915_s15 + $0x30] sm:$0xff]  ;;  %v202_v14 = vsel %vm180_vm0, %v948_v12, 0.0  ;;  %v961_v17 = vld [vmem:[%s915_s15 + $0x40] sm:$0xff]  ;;  %v311_v3 = vmul.f32 %v931_v5, %v931_v5 }
  0x14   : > { %v196_v10 = vsel %vm180_vm0, %v938_v8, 0.0  ;;  %v199_v15 = vsel %vm180_vm0, %v951_v13, 0.0  ;;  %v958_v16 = vld [vmem:[%s915_s15 + $0x48] sm:$0xff]  ;;  %v205_v19 = vsel %vm180_vm0, %v961_v17, 0.0  ;;  %v968_v20 = vld [vmem:[%s915_s15 + $0x58] sm:$0xff]  ;;  %v971_v21 = vld [vmem:[%s915_s15 + $0x50] sm:$0xff]  ;;  %v310_v4 = vmul.f32 %v921_v1, %v921_v1 }
  0x15   : > { %v208_v18 = vsel %vm180_vm0, %v958_v16, 0.0  ;;  %v214_v22 = vsel %vm180_vm0, %v968_v20, 0.0  ;;  %v211_v23 = vsel %vm180_vm0, %v971_v21, 0.0  ;;  %v978_v24 = vld [vmem:[%s915_s15 + $0x68] sm:$0xff]  ;;  %v981_v25 = vld [vmem:[%s915_s15 + $0x60] sm:$0xff]  ;;  %v988_v28 = vld [vmem:[%s915_s15 + $0x78] sm:$0xff] }
  0x16   : > { %1446 = vst [vmem:[#allocation2_spill] sm:$0xff] %v978_v24  ;;  %1447 = vst [vmem:[#allocation3_spill] sm:$0xff] %v981_v25  ;;  %v220_v26 = vsel %vm180_vm0, %v978_v24, 0.0  ;;  %v217_v27 = vsel %vm180_vm0, %v981_v25, 0.0  ;;  %v991_v29 = vld [vmem:[%s915_s15 + $0x70] sm:$0xff]  ;;  %v226_v30 = vsel %vm180_vm0, %v988_v28, 0.0 }
  0x17   : > { %191 = vadd.xlane.f32.xlu1 %v190_v6  ;;  %185 = vadd.xlane.f32.xlu0 %v184_v7  ;;  %1448 = vst [vmem:[#allocation4_spill] sm:$0xff] %v988_v28  ;;  %1449 = vst [vmem:[#allocation5_spill] sm:$0xff] %v991_v29  ;;  %v223_v31 = vsel %vm180_vm0, %v991_v29, 0.0  ;;  %v998_v32 = vld [vmem:[%s915_s15 + $0x88] sm:$0xff]  ;;  %v1001_v33 = vld [vmem:[%s915_s15 + $0x80] sm:$0xff]  ;;  %v345_v6 = vsel %vm180_vm0, %v311_v3, 0.0 }
  0x18   : > { %1450 = vst [vmem:[#allocation6_spill] sm:$0xff] %v998_v32  ;;  %1451 = vst [vmem:[#allocation7_spill] sm:$0xff] %v1001_v33  ;;  %v232_v34 = vsel %vm180_vm0, %v998_v32, 0.0  ;;  %v229_v35 = vsel %vm180_vm0, %v1001_v33, 0.0  ;;  %v1008_v36 = vld [vmem:[%s915_s15 + $0x98] sm:$0xff]  ;;  %v1011_v37 = vld [vmem:[%s915_s15 + $0x90] sm:$0xff]  ;;  %v327_v3 = vmul.f32 %v998_v32, %v998_v32 }
  0x19   : > { %1452 = vst [vmem:[#allocation8_spill] sm:$0xff] %v1008_v36  ;;  %1453 = vst [vmem:[#allocation9_spill] sm:$0xff] %v1011_v37  ;;  %v238_v38 = vsel %vm180_vm0, %v1008_v36, 0.0  ;;  %v235_v39 = vsel %vm180_vm0, %v1011_v37, 0.0  ;;  %v1018_v40 = vld [vmem:[%s915_s15 + $0xa8] sm:$0xff]  ;;  %v1021_v41 = vld [vmem:[%s915_s15 + $0xa0] sm:$0xff] }
  0x1a   : > { %1454 = vst [vmem:[#allocation10_spill] sm:$0xff] %v1018_v40  ;;  %1455 = vst [vmem:[#allocation11_spill] sm:$0xff] %v1021_v41  ;;  %v244_v42 = vsel %vm180_vm0, %v1018_v40, 0.0  ;;  %v241_v43 = vsel %vm180_vm0, %v1021_v41, 0.0  ;;  %v1028_v44 = vld [vmem:[%s915_s15 + $0xb8] sm:$0xff]  ;;  %v1031_v45 = vld [vmem:[%s915_s15 + $0xb0] sm:$0xff] }
  0x1b   : > { %197 = vadd.xlane.f32.xlu1 %v196_v10  ;;  %194 = vadd.xlane.f32.xlu0 %v193_v11  ;;  %1456 = vst [vmem:[#allocation12_spill] sm:$0xff] %v1028_v44  ;;  %1457 = vst [vmem:[#allocation13_spill] sm:$0xff] %v1031_v45  ;;  %v250_v46 = vsel %vm180_vm0, %v1028_v44, 0.0  ;;  %v247_v47 = vsel %vm180_vm0, %v1031_v45, 0.0  ;;  %v1038_v48 = vld [vmem:[%s915_s15 + $0xc8] sm:$0xff]  ;;  %v1041_v49 = vld [vmem:[%s915_s15 + $0xc0] sm:$0xff]  ;;  %v313_v10 = vmul.f32 %v924_v2, %v924_v2 }
  0x1c   : > { %1458 = vst [vmem:[#allocation14_spill] sm:$0xff] %v1038_v48  ;;  %1459 = vst [vmem:[#allocation15_spill] sm:$0xff] %v1041_v49  ;;  %v256_v50 = vsel %vm180_vm0, %v1038_v48, 0.0  ;;  %v253_v51 = vsel %vm180_vm0, %v1041_v49, 0.0  ;;  %v1048_v52 = vld [vmem:[%s915_s15 + $0xd8] sm:$0xff]  ;;  %v1051_v53 = vld [vmem:[%s915_s15 + $0xd0] sm:$0xff]  ;;  %v312_v11 = vmul.f32 %v918_v0, %v918_v0 }
  0x1d   : > { %1460 = vst [vmem:[#allocation16_spill] sm:$0xff] %v1048_v52  ;;  %1461 = vst [vmem:[#allocation17_spill] sm:$0xff] %v1051_v53  ;;  %v262_v54 = vsel %vm180_vm0, %v1048_v52, 0.0  ;;  %v259_v55 = vsel %vm180_vm0, %v1051_v53, 0.0  ;;  %v1058_v56 = vld [vmem:[%s915_s15 + $0xe8] sm:$0xff]  ;;  %v1061_v57 = vld [vmem:[%s915_s15 + $0xe0] sm:$0xff] }
  0x1e   : > { %v268_v58 = vsel %vm180_vm0, %v1058_v56, 0.0  ;;  %v265_v59 = vsel %vm180_vm0, %v1061_v57, 0.0  ;;  %v1068_v60 = vld [vmem:[%s915_s15 + $0xf8] sm:$0xff]  ;;  %v1071_v61 = vld [vmem:[%s915_s15 + $0xf0] sm:$0xff]  ;;  %v342_v7 = vsel %vm180_vm0, %v310_v4, 0.0  ;;  %v326_v4 = vmul.f32 %v1001_v33, %v1001_v33 }
  0x1f   : > { %203 = vadd.xlane.f32.xlu1 %v202_v14  ;;  %200 = vadd.xlane.f32.xlu0 %v199_v15  ;;  %v274_v62 = vsel %vm180_vm0, %v1068_v60, 0.0  ;;  %v271_v63 = vsel %vm180_vm0, %v1071_v61, 0.0  ;;  %v351_v14 = vsel %vm180_vm0, %v313_v10, 0.0  ;;  %v348_v15 = vsel %vm180_vm0, %v312_v11, 0.0 }
  0x20   : > { %v329_v10 = vmul.f32 %v1008_v36, %v1008_v36  ;;  %v328_v11 = vmul.f32 %v1011_v37, %v1011_v37 }
  0x23   : > { %209 = vadd.xlane.f32.xlu1 %v208_v18  ;;  %206 = vadd.xlane.f32.xlu0 %v205_v19  ;;  %v315_v18 = vmul.f32 %v938_v8, %v938_v8  ;;  %v314_v19 = vmul.f32 %v941_v9, %v941_v9 }
  0x27   : > { %215 = vadd.xlane.f32.xlu1 %v214_v22  ;;  %212 = vadd.xlane.f32.xlu0 %v211_v23  ;;  %v357_v22 = vsel %vm180_vm0, %v315_v18, 0.0  ;;  %v354_v23 = vsel %vm180_vm0, %v314_v19, 0.0  ;;  %v331_v18 = vmul.f32 %v1018_v40, %v1018_v40  ;;  %v330_v19 = vmul.f32 %v1021_v41, %v1021_v41 }
  0x2b   : > { %221 = vadd.xlane.f32.xlu1 %v220_v26  ;;  %218 = vadd.xlane.f32.xlu0 %v217_v27  ;;  %v317_v26 = vmul.f32 %v948_v12, %v948_v12  ;;  %v316_v27 = vmul.f32 %v951_v13, %v951_v13 }
  0x2f   : > { %227 = vadd.xlane.f32.xlu1 %v226_v30  ;;  %224 = vadd.xlane.f32.xlu0 %v223_v31  ;;  %v363_v30 = vsel %vm180_vm0, %v317_v26, 0.0  ;;  %v360_v31 = vsel %vm180_vm0, %v316_v27, 0.0  ;;  %v333_v26 = vmul.f32 %v1028_v44, %v1028_v44  ;;  %v332_v27 = vmul.f32 %v1031_v45, %v1031_v45 }
  0x33   : > { %233 = vadd.xlane.f32.xlu1 %v232_v34  ;;  %230 = vadd.xlane.f32.xlu0 %v229_v35  ;;  %v319_v34 = vmul.f32 %v958_v16, %v958_v16  ;;  %v318_v35 = vmul.f32 %v961_v17, %v961_v17 }
  0x37   : > { %239 = vadd.xlane.f32.xlu1 %v238_v38  ;;  %236 = vadd.xlane.f32.xlu0 %v235_v39  ;;  %v369_v38 = vsel %vm180_vm0, %v319_v34, 0.0  ;;  %v366_v39 = vsel %vm180_vm0, %v318_v35, 0.0  ;;  %v335_v34 = vmul.f32 %v1038_v48, %v1038_v48  ;;  %v334_v35 = vmul.f32 %v1041_v49, %v1041_v49 }
  0x3b   : > { %245 = vadd.xlane.f32.xlu1 %v244_v42  ;;  %242 = vadd.xlane.f32.xlu0 %v241_v43  ;;  %v321_v42 = vmul.f32 %v968_v20, %v968_v20  ;;  %v320_v43 = vmul.f32 %v971_v21, %v971_v21 }
  0x3f   : > { %251 = vadd.xlane.f32.xlu1 %v250_v46  ;;  %248 = vadd.xlane.f32.xlu0 %v247_v47  ;;  %v375_v46 = vsel %vm180_vm0, %v321_v42, 0.0  ;;  %v372_v47 = vsel %vm180_vm0, %v320_v43, 0.0  ;;  %v337_v42 = vmul.f32 %v1048_v52, %v1048_v52  ;;  %v336_v43 = vmul.f32 %v1051_v53, %v1051_v53 }
  0x43   : > { %257 = vadd.xlane.f32.xlu1 %v256_v50  ;;  %254 = vadd.xlane.f32.xlu0 %v253_v51  ;;  %v323_v50 = vmul.f32 %v978_v24, %v978_v24  ;;  %v322_v51 = vmul.f32 %v981_v25, %v981_v25 }
  0x47   : > { %263 = vadd.xlane.f32.xlu1 %v262_v54  ;;  %260 = vadd.xlane.f32.xlu0 %v259_v55  ;;  %v381_v54 = vsel %vm180_vm0, %v323_v50, 0.0  ;;  %v378_v55 = vsel %vm180_vm0, %v322_v51, 0.0  ;;  %v339_v50 = vmul.f32 %v1058_v56, %v1058_v56  ;;  %v338_v51 = vmul.f32 %v1061_v57, %v1061_v57 }
  0x4b   : > { %269 = vadd.xlane.f32.xlu1 %v268_v58  ;;  %266 = vadd.xlane.f32.xlu0 %v265_v59  ;;  %v325_v58 = vmul.f32 %v988_v28, %v988_v28  ;;  %v324_v59 = vmul.f32 %v991_v29, %v991_v29 }
  0x4f   : > { %275 = vadd.xlane.f32.xlu1 %v274_v62  ;;  %272 = vadd.xlane.f32.xlu0 %v271_v63  ;;  %v387_v62 = vsel %vm180_vm0, %v325_v58, 0.0  ;;  %v384_v63 = vsel %vm180_vm0, %v324_v59, 0.0  ;;  %v341_v58 = vmul.f32 %v1068_v60, %v1068_v60  ;;  %v340_v59 = vmul.f32 %v1071_v61, %v1071_v61 }
  0x51   : > { %v432_v56 = vsel %vm180_vm0, %v340_v59, 0.0 }
  0x53   : > { %346 = vadd.xlane.f32.xlu1 %v345_v6  ;;  %343 = vadd.xlane.f32.xlu0 %v342_v7  ;;  %v393_v6 = vsel %vm180_vm0, %v327_v3, 0.0  ;;  %v390_v7 = vsel %vm180_vm0, %v326_v4, 0.0 }
  0x57   : > { %352 = vadd.xlane.f32.xlu1 %v351_v14  ;;  %349 = vadd.xlane.f32.xlu0 %v348_v15  ;;  %v399_v14 = vsel %vm180_vm0, %v329_v10, 0.0  ;;  %v396_v15 = vsel %vm180_vm0, %v328_v11, 0.0 }
  0x5b   : > { %358 = vadd.xlane.f32.xlu1 %v357_v22  ;;  %355 = vadd.xlane.f32.xlu0 %v354_v23  ;;  %v405_v22 = vsel %vm180_vm0, %v331_v18, 0.0  ;;  %v402_v23 = vsel %vm180_vm0, %v330_v19, 0.0 }
  0x5f   : > { %364 = vadd.xlane.f32.xlu1 %v363_v30  ;;  %361 = vadd.xlane.f32.xlu0 %v360_v31  ;;  %v411_v30 = vsel %vm180_vm0, %v333_v26, 0.0  ;;  %v408_v31 = vsel %vm180_vm0, %v332_v27, 0.0 }
  0x63   : > { %370 = vadd.xlane.f32.xlu1 %v369_v38  ;;  %367 = vadd.xlane.f32.xlu0 %v366_v39  ;;  %v417_v38 = vsel %vm180_vm0, %v335_v34, 0.0  ;;  %v414_v39 = vsel %vm180_vm0, %v334_v35, 0.0 }
  0x67   : > { %376 = vadd.xlane.f32.xlu1 %v375_v46  ;;  %373 = vadd.xlane.f32.xlu0 %v372_v47  ;;  %v423_v46 = vsel %vm180_vm0, %v337_v42, 0.0  ;;  %v420_v47 = vsel %vm180_vm0, %v336_v43, 0.0 }
  0x6b   : > { %382 = vadd.xlane.f32.xlu1 %v381_v54  ;;  %379 = vadd.xlane.f32.xlu0 %v378_v55  ;;  %v429_v54 = vsel %vm180_vm0, %v339_v50, 0.0  ;;  %v426_v55 = vsel %vm180_vm0, %v338_v51, 0.0 }
  0x6f   : > { %388 = vadd.xlane.f32.xlu1 %v387_v62  ;;  %385 = vadd.xlane.f32.xlu0 %v384_v63  ;;  %v435_v62 = vsel %vm180_vm0, %v341_v58, 0.0 }
  0x73   : > { %394 = vadd.xlane.f32.xlu1 %v393_v6  ;;  %391 = vadd.xlane.f32.xlu0 %v390_v7 }
  0x77   : > { %400 = vadd.xlane.f32.xlu1 %v399_v14  ;;  %397 = vadd.xlane.f32.xlu0 %v396_v15 }
  0x7b   : > { %406 = vadd.xlane.f32.xlu1 %v405_v22  ;;  %403 = vadd.xlane.f32.xlu0 %v402_v23 }
  0x7f   : > { %412 = vadd.xlane.f32.xlu1 %v411_v30  ;;  %409 = vadd.xlane.f32.xlu0 %v408_v31 }
  0x83   : > { %418 = vadd.xlane.f32.xlu1 %v417_v38  ;;  %415 = vadd.xlane.f32.xlu0 %v414_v39 }
  0x87   : > { %424 = vadd.xlane.f32.xlu1 %v423_v46  ;;  %421 = vadd.xlane.f32.xlu0 %v420_v47 }
  0x8b   : > { %430 = vadd.xlane.f32.xlu1 %v429_v54  ;;  %427 = vadd.xlane.f32.xlu0 %v426_v55 }
  0x8f   : > { %436 = vadd.xlane.f32.xlu1 %v435_v62  ;;  %433 = vadd.xlane.f32.xlu0 %v432_v56 }
  0x9c   : > { %v189_v57 = vpop.xlane.xlu1 %188  ;;  %v183_v63 = vpop.xlane.xlu0 %182 }
  0x9d   : > { %v278_v58 = vmul.f32 0.020833334, %v183_v63  ;;  %v280_v62 = vmul.f32 0.020833334, %v189_v57 }
  0x9f   : > { %v470_v45 = vmul.f32 %v278_v58, %v278_v58  ;;  %v472_v33 = vmul.f32 %v280_v62, %v280_v62 }
  0xa0   : > { %v192_v3 = vpop.xlane.xlu1 %191  ;;  %v186_v4 = vpop.xlane.xlu0 %185 }
  0xa1   : > { %v279_v59 = vmul.f32 0.020833334, %v186_v4  ;;  %v281_v56 = vmul.f32 0.020833334, %v192_v3 }
  0xa3   : > { %v471_v44 = vmul.f32 %v279_v59, %v279_v59  ;;  %v473_v32 = vmul.f32 %v281_v56, %v281_v56 }
  0xa4   : > { %v198_v6 = vpop.xlane.xlu1 %197  ;;  %v195_v7 = vpop.xlane.xlu0 %194 }
  0xa5   : > { %v283_v53 = vmul.f32 0.020833334, %v198_v6  ;;  %v282_v52 = vmul.f32 0.020833334, %v195_v7 }
  0xa7   : > { %v475_v25 = vmul.f32 %v283_v53, %v283_v53 }
  0xa8   : > { %v204_v10 = vpop.xlane.xlu1 %203  ;;  %v201_v11 = vpop.xlane.xlu0 %200 }
  0xa9   : > { %v285_v37 = vmul.f32 0.020833334, %v204_v10  ;;  %v284_v36 = vmul.f32 0.020833334, %v201_v11 }
  0xab   : > { %v477_v58 = vmul.f32 %v285_v37, %v285_v37  ;;  %v476_v59 = vmul.f32 %v284_v36, %v284_v36 }
  0xac   : > { %v210_v60 = vpop.xlane.xlu1 %209  ;;  %v207_v14 = vpop.xlane.xlu0 %206 }
  0xad   : > { %v287_v63 = vmul.f32 0.020833334, %v210_v60  ;;  %v286_v4 = vmul.f32 0.020833334, %v207_v14 }
  0xb0   : > { %v216_v15 = vpop.xlane.xlu1 %215  ;;  %v213_v61 = vpop.xlane.xlu0 %212 }
  0xb4   : > { %v222_v18 = vpop.xlane.xlu1 %221  ;;  %v219_v19 = vpop.xlane.xlu0 %218 }
  0xb8   : > { %v1173_v22 = vpop.xlane.xlu1 %227  ;;  %v1175_v23 = vpop.xlane.xlu0 %224 }
  0xb9   : > { %v293_v36 = vmul.f32 0.020833334, %v1173_v22 }
  0xbc   : > { %v1177_v26 = vpop.xlane.xlu1 %233  ;;  %v1179_v27 = vpop.xlane.xlu0 %230 }
  0xc0   : > { %v1181_v30 = vpop.xlane.xlu1 %239  ;;  %v1183_v31 = vpop.xlane.xlu0 %236 }
  0xc4   : > { %v1185_v34 = vpop.xlane.xlu1 %245  ;;  %v1187_v35 = vpop.xlane.xlu0 %242 }
  0xc8   : > { %v1189_v38 = vpop.xlane.xlu1 %251  ;;  %v1191_v39 = vpop.xlane.xlu0 %248 }
  0xcc   : > { %v1193_v42 = vpop.xlane.xlu1 %257  ;;  %v1195_v43 = vpop.xlane.xlu0 %254 }
  0xd0   : > { %v1197_v46 = vpop.xlane.xlu1 %263  ;;  %v1199_v47 = vpop.xlane.xlu0 %260 }
  0xd4   : > { %v1201_v50 = vpop.xlane.xlu1 %269  ;;  %v1203_v51 = vpop.xlane.xlu0 %266 }
  0xd8   : > { %v1205_v54 = vpop.xlane.xlu1 %275  ;;  %v1207_v55 = vpop.xlane.xlu0 %272 }
  0xd9   : > { %1462 = vst [vmem:[#allocation18_spill] sm:$0xff] %v1205_v54  ;;  %1463 = vst [vmem:[#allocation19_spill] sm:$0xff] %v1207_v55  ;;  %v474_v55 = vmul.f32 %v282_v52, %v282_v52 }
  0xdc   : > { %v347_v49 = vpop.xlane.xlu1 %346  ;;  %v344_v48 = vpop.xlane.xlu0 %343 }
  0xdd   : > { %v439_v41 = vmul.f32 0.020833334, %v347_v49  ;;  %v438_v40 = vmul.f32 0.020833334, %v344_v48  ;;  %v289_v49 = vmul.f32 0.020833334, %v216_v15 }
  0xde   : > { %v288_v48 = vmul.f32 0.020833334, %v213_v61 }
  0xdf   : > { %v503_v29 = vsub.f32 %v439_v41, %v471_v44  ;;  %v502_v28 = vsub.f32 %v438_v40, %v470_v45  ;;  %v479_v41 = vmul.f32 %v287_v63, %v287_v63  ;;  %v1209_v40 = vmul.f32 %v286_v4, %v286_v4 }
  0xe0   : > { %v353_v57 = vpop.xlane.xlu1 %352  ;;  %v350_v3 = vpop.xlane.xlu0 %349  ;;  %v291_v44 = vmul.f32 0.020833334, %v222_v18  ;;  %v290_v45 = vmul.f32 0.020833334, %v219_v19  ;;  %v1211_v14 = vmul.f32 %v289_v49, %v289_v49  ;;  %v1214_v15 = vmul.f32 %v288_v48, %v288_v48 }
  0xe1   : > { %v535_v6 = vmax.f32 %v503_v29, 0.0  ;;  %v534_v7 = vmax.f32 %v502_v28, 0.0  ;;  %v441_v24 = vmul.f32 0.020833334, %v353_v57  ;;  %v440_v54 = vmul.f32 0.020833334, %v350_v3 }
  0xe2   : > { %v1216_v61 = vmul.f32 %v291_v44, %v291_v44  ;;  %v1218_v18 = vmul.f32 %v290_v45, %v290_v45  ;;  %v292_v19 = vmul.f32 0.020833334, %v1175_v23  ;;  %v297_v23 = vmul.f32 0.020833334, %v1181_v30 }
  0xe3   : > { %v567_v10 = vadd.f32 1e-05, %v535_v6  ;;  %v566_v11 = vadd.f32 1e-05, %v534_v7  ;;  %v505_v62 = vsub.f32 %v441_v24, %v473_v32  ;;  %v504_v56 = vsub.f32 %v440_v54, %v472_v33 }
  0xe4   : > { %v359_v52 = vpop.xlane.xlu1 %358  ;;  %v356_v53 = vpop.xlane.xlu0 %355  ;;  %v1221_v6 = vmul.f32 %v293_v36, %v293_v36  ;;  %v295_v7 = vmul.f32 0.020833334, %v1177_v26  ;;  %v1234_v36 = vmul.f32 %v297_v23, %v297_v23 }
  0xe5   : > { %808 = vrsqrt.f32 %v567_v10  ;;  %v537_v29 = vmax.f32 %v505_v62, 0.0  ;;  %v536_v28 = vmax.f32 %v504_v56, 0.0  ;;  %v443_v60 = vmul.f32 0.020833334, %v359_v52 }
  0xe6   : > { %810 = vrsqrt.f32 %v566_v11  ;;  %v442_v37 = vmul.f32 0.020833334, %v356_v53  ;;  %v1225_v62 = vmul.f32 %v292_v19, %v292_v19 }
  0xe7   : > { %v569_v24 = vadd.f32 1e-05, %v537_v29  ;;  %v568_v32 = vadd.f32 1e-05, %v536_v28  ;;  %v507_v33 = vsub.f32 %v443_v60, %v475_v25  ;;  %v294_v25 = vmul.f32 0.020833334, %v1179_v27 }
  0xe8   : > { %v506_v54 = vsub.f32 %v442_v37, %v474_v55  ;;  %v365_v63 = vpop.xlane.xlu1 %364  ;;  %v362_v4 = vpop.xlane.xlu0 %361  ;;  %v296_v55 = vmul.f32 0.020833334, %v1183_v31  ;;  %v1229_v29 = vmul.f32 %v295_v7, %v295_v7  ;;  %v299_v27 = vmul.f32 0.020833334, %v1185_v34 }
  0xe9   : > { %812 = vrsqrt.f32 %v569_v24  ;;  %v539_v57 = vmax.f32 %v507_v33, 0.0  ;;  %v445_v3 = vmul.f32 0.020833334, %v365_v63  ;;  %v444_v22 = vmul.f32 0.020833334, %v362_v4 }
  0xea   : > { %814 = vrsqrt.f32 %v568_v32  ;;  %v538_v49 = vmax.f32 %v506_v54, 0.0  ;;  %v1236_v31 = vmul.f32 %v296_v55, %v296_v55  ;;  %v298_v37 = vmul.f32 0.020833334, %v1187_v35 }
  0xeb   : > { %v571_v48 = vadd.f32 1e-05, %v539_v57  ;;  %v509_v10 = vsub.f32 %v445_v3, %v477_v58  ;;  %v508_v11 = vsub.f32 %v444_v22, %v476_v59  ;;  %v1232_v59 = vmul.f32 %v294_v25, %v294_v25  ;;  %v1246_v57 = vld [vmem:[%s1428_s1] ss:$0 sm:$0xff] }
  0xec   : > { %v570_v56 = vadd.f32 1e-05, %v538_v49  ;;  %v371_v44 = vpop.xlane.xlu1 %370  ;;  %v368_v45 = vpop.xlane.xlu0 %367  ;;  %v1240_v4 = vmul.f32 %v299_v27, %v299_v27  ;;  %v300_v25 = vmul.f32 0.020833334, %v1191_v39  ;;  %v303_v27 = vmul.f32 0.020833334, %v1193_v42 }
  0xed   : > { %816 = vrsqrt.f32 %v571_v48  ;;  %v541_v52 = vmax.f32 %v509_v10, 0.0  ;;  %v540_v53 = vmax.f32 %v508_v11, 0.0  ;;  %v447_v26 = vmul.f32 0.020833334, %v371_v44 }
  0xee   : > { %818 = vrsqrt.f32 %v570_v56  ;;  %v446_v58 = vmul.f32 0.020833334, %v368_v45 }
  0xef   : > { %v573_v28 = vadd.f32 1e-05, %v541_v52  ;;  %v572_v60 = vadd.f32 1e-05, %v540_v53  ;;  %v511_v30 = vsub.f32 %v447_v26, %v479_v41  ;;  %v301_v41 = vmul.f32 0.020833334, %v1189_v38 }
  0xf0   : > { %v510_v24 = vsub.f32 %v446_v58, %v1209_v40  ;;  %v377_v32 = vpop.xlane.xlu1 %376  ;;  %v374_v33 = vpop.xlane.xlu0 %373  ;;  %v1258_v38 = vmul.f32 %v298_v37, %v298_v37 }
  0xf1   : > { %820 = vrsqrt.f32 %v573_v28  ;;  %v543_v34 = vmax.f32 %v511_v30, 0.0  ;;  %v449_v19 = vmul.f32 0.020833334, %v377_v32  ;;  %v448_v54 = vmul.f32 0.020833334, %v374_v33 }
  0xf2   : > { %v809_v63 = vpop.eup %808  ;;  %822 = vrsqrt.f32 %v572_v60  ;;  %v542_v35 = vmax.f32 %v510_v24, 0.0  ;;  %v1264_v39 = vmul.f32 %v301_v41, %v301_v41  ;;  %v302_v41 = vmul.f32 0.020833334, %v1195_v43 }
  0xf3   : > { %v811_v40 = vpop.eup %810  ;;  %v631_v3 = vmul.f32 %v809_v63, %v931_v5  ;;  %v575_v22 = vadd.f32 1e-05, %v543_v34  ;;  %v513_v7 = vsub.f32 %v449_v19, %v1211_v14  ;;  %v512_v49 = vsub.f32 %v448_v54, %v1214_v15 }
  0xf4   : > { %v630_v48 = vmul.f32 %v811_v40, %v921_v1  ;;  %v574_v10 = vadd.f32 1e-05, %v542_v35  ;;  %v383_v5 = vpop.xlane.xlu1 %382  ;;  %v380_v11 = vpop.xlane.xlu0 %379  ;;  %v1277_v54 = vmul.f32 %v300_v25, %v300_v25 }
  0xf5   : > { %v669_v14 = vmul.f32 %v1246_v57, %v631_v3  ;;  %824 = vrsqrt.f32 %v575_v22  ;;  %v545_v15 = vmax.f32 %v513_v7, 0.0  ;;  %v544_v23 = vmax.f32 %v512_v49, 0.0 }
  0xf6   : > { %v813_v55 = vpop.eup %812  ;;  %v668_v56 = vmul.f32 %v1246_v57, %v630_v48  ;;  %826 = vrsqrt.f32 %v574_v10  ;;  %v451_v44 = vmul.f32 0.020833334, %v383_v5  ;;  %v450_v45 = vmul.f32 0.020833334, %v380_v11 }
  0xf7   : > { %v815_v52 = vpop.eup %814  ;;  %701 = vst.msk [vmem:[%s1256_s20 + $0x8] sm:$0xff] %vm180_vm0, %v669_v14  ;;  %v633_v1 = vmul.f32 %v813_v55, %v924_v2  ;;  %v577_v53 = vadd.f32 1e-05, %v545_v15  ;;  %v576_v26 = vadd.f32 1e-05, %v544_v23  ;;  %v1289_v10 = vmul.f32 %v303_v27, %v303_v27 }
  0xf8   : > { %700 = vst.msk [vmem:[%s1256_s20] sm:$0xff] %vm180_vm0, %v668_v56  ;;  %v632_v58 = vmul.f32 %v815_v52, %v918_v0  ;;  %v515_v28 = vsub.f32 %v451_v44, %v1216_v61  ;;  %v514_v60 = vsub.f32 %v450_v45, %v1218_v18  ;;  %v389_v30 = vpop.xlane.xlu1 %388  ;;  %v386_v37 = vpop.xlane.xlu0 %385  ;;  %v305_v15 = vmul.f32 0.020833334, %v1197_v46 }
  0xf9   : > { %v671_v24 = vmul.f32 %v1246_v57, %v633_v1  ;;  %828 = vrsqrt.f32 %v577_v53  ;;  %v453_v2 = vmul.f32 0.020833334, %v389_v30  ;;  %v452_v32 = vmul.f32 0.020833334, %v386_v37 }
  0xfa   : > { %v817_v33 = vpop.eup %816  ;;  %v670_v42 = vmul.f32 %v1246_v57, %v632_v58  ;;  %830 = vrsqrt.f32 %v576_v26  ;;  %v547_v34 = vmax.f32 %v515_v28, 0.0  ;;  %v546_v19 = vmax.f32 %v514_v60, 0.0 }
  0xfb   : > { %v819_v0 = vpop.eup %818  ;;  %703 = vst.msk [vmem:[%s1256_s20 + $0x18] sm:$0xff] %vm180_vm0, %v671_v24  ;;  %v635_v61 = vmul.f32 %v817_v33, %v938_v8  ;;  %v517_v18 = vsub.f32 %v453_v2, %v1221_v6  ;;  %v516_v63 = vsub.f32 %v452_v32, %v1225_v62  ;;  %v1303_v58 = vmul.f32 %v302_v41, %v302_v41 }
  0xfc   : > { %702 = vst.msk [vmem:[%s1256_s20 + $0x10] sm:$0xff] %vm180_vm0, %v670_v42  ;;  %v634_v35 = vmul.f32 %v819_v0, %v941_v9  ;;  %v579_v40 = vadd.f32 1e-05, %v547_v34  ;;  %v578_v3 = vadd.f32 1e-05, %v546_v19  ;;  %v395_v22 = vpop.xlane.xlu1 %394  ;;  %v392_v7 = vpop.xlane.xlu0 %391  ;;  %v1315_v19 = vmul.f32 %v305_v15, %v305_v15 }
  0xfd   : > { %v673_v49 = vmul.f32 %v1246_v57, %v635_v61  ;;  %v549_v25 = vmax.f32 %v517_v18, 0.0  ;;  %v548_v8 = vmax.f32 %v516_v63, 0.0  ;;  %v455_v48 = vmul.f32 0.020833334, %v395_v22 }
  0xfe   : > { %v821_v6 = vpop.eup %820  ;;  %v672_v43 = vmul.f32 %v1246_v57, %v634_v35  ;;  %832 = vrsqrt.f32 %v579_v40  ;;  %v454_v62 = vmul.f32 0.020833334, %v392_v7  ;;  %v304_v60 = vmul.f32 0.020833334, %v1199_v47 }
  0xff   : > { %v823_v5 = vpop.eup %822  ;;  %705 = vst.msk [vmem:[%s1256_s20 + $0x28] sm:$0xff] %vm180_vm0, %v673_v49  ;;  %v637_v9 = vmul.f32 %v821_v6, %v948_v12  ;;  %834 = vrsqrt.f32 %v578_v3  ;;  %v581_v11 = vadd.f32 1e-05, %v549_v25  ;;  %v580_v14 = vadd.f32 1e-05, %v548_v8 }
 0x100   : > { %704 = vst.msk [vmem:[%s1256_s20 + $0x20] sm:$0xff] %vm180_vm0, %v672_v43  ;;  %v636_v23 = vmul.f32 %v823_v5, %v951_v13  ;;  %v519_v55 = vsub.f32 %v455_v48, %v1229_v29  ;;  %v518_v56 = vsub.f32 %v454_v62, %v1232_v59  ;;  %v401_v44 = vpop.xlane.xlu1 %400  ;;  %v398_v45 = vpop.xlane.xlu0 %397  ;;  %v1321_v63 = vmul.f32 %v304_v60, %v304_v60  ;;  %v1464_v5 = vld [vmem:[#allocation18_spill] sm:$0xff] }
 0x101   : > { %v675_v52 = vmul.f32 %v1246_v57, %v637_v9  ;;  %836 = vrsqrt.f32 %v581_v11  ;;  %v457_v12 = vmul.f32 0.020833334, %v401_v44  ;;  %v456_v1 = vmul.f32 0.020833334, %v398_v45  ;;  %v1465_v11 = vld [vmem:[#allocation2_spill] sm:$0xff] }
 0x102   : > { %v825_v53 = vpop.eup %824  ;;  %v674_v46 = vmul.f32 %v1246_v57, %v636_v23  ;;  %838 = vrsqrt.f32 %v580_v14  ;;  %v551_v26 = vmax.f32 %v519_v55, 0.0  ;;  %v550_v27 = vmax.f32 %v518_v56, 0.0  ;;  %v1466_v56 = vld [vmem:[#allocation3_spill] sm:$0xff] }
 0x103   : > { %v827_v13 = vpop.eup %826  ;;  %707 = vst.msk [vmem:[%s1256_s20 + $0x38] sm:$0xff] %vm180_vm0, %v675_v52  ;;  %v639_v29 = vmul.f32 %v825_v53, %v958_v16  ;;  %v521_v59 = vsub.f32 %v457_v12, %v1234_v36  ;;  %v520_v28 = vsub.f32 %v456_v1, %v1236_v31  ;;  %v309_v9 = vmul.f32 0.020833334, %v1464_v5  ;;  %v1467_v12 = vld [vmem:[#allocation19_spill] sm:$0xff]  ;;  %v1473_v5 = vld [vmem:[#allocation9_spill] sm:$0xff] }
 0x104   : > { %706 = vst.msk [vmem:[%s1256_s20 + $0x30] sm:$0xff] %vm180_vm0, %v674_v46  ;;  %v638_v30 = vmul.f32 %v827_v13, %v961_v17  ;;  %v583_v37 = vadd.f32 1e-05, %v551_v26  ;;  %v582_v24 = vadd.f32 1e-05, %v550_v27  ;;  %v407_v2 = vpop.xlane.xlu1 %406  ;;  %v404_v32 = vpop.xlane.xlu0 %403  ;;  %v1468_v27 = vld [vmem:[#allocation4_spill] sm:$0xff] }
 0x105   : > { %v677_v33 = vmul.f32 %v1246_v57, %v639_v29  ;;  %v553_v42 = vmax.f32 %v521_v59, 0.0  ;;  %v552_v16 = vmax.f32 %v520_v28, 0.0  ;;  %v459_v34 = vmul.f32 0.020833334, %v407_v2  ;;  %v1469_v59 = vld [vmem:[#allocation5_spill] sm:$0xff] }
 0x106   : > { %v829_v36 = vpop.eup %828  ;;  %v676_v47 = vmul.f32 %v1246_v57, %v638_v30  ;;  %840 = vrsqrt.f32 %v583_v37  ;;  %v458_v31 = vmul.f32 0.020833334, %v404_v32 }
 0x107   : > { %v831_v0 = vpop.eup %830  ;;  %709 = vst.msk [vmem:[%s1256_s20 + $0x48] sm:$0xff] %vm180_vm0, %v677_v33  ;;  %v641_v17 = vmul.f32 %v829_v36, %v968_v20  ;;  %842 = vrsqrt.f32 %v582_v24  ;;  %v585_v61 = vadd.f32 1e-05, %v553_v42  ;;  %v584_v18 = vadd.f32 1e-05, %v552_v16 }
 0x108   : > { %708 = vst.msk [vmem:[%s1256_s20 + $0x40] sm:$0xff] %vm180_vm0, %v676_v47  ;;  %v640_v41 = vmul.f32 %v831_v0, %v971_v21  ;;  %v523_v35 = vsub.f32 %v459_v34, %v1240_v4  ;;  %v522_v40 = vsub.f32 %v458_v31, %v1258_v38  ;;  %v413_v3 = vpop.xlane.xlu1 %412  ;;  %v410_v22 = vpop.xlane.xlu0 %409  ;;  %v307_v21 = vmul.f32 0.020833334, %v1201_v50 }
 0x109   : > { %v679_v7 = vmul.f32 %v1246_v57, %v641_v17  ;;  %844 = vrsqrt.f32 %v585_v61  ;;  %v461_v20 = vmul.f32 0.020833334, %v413_v3  ;;  %v460_v49 = vmul.f32 0.020833334, %v410_v22 }
 0x10a   : > { %v678_v25 = vmul.f32 %v1246_v57, %v640_v41  ;;  %846 = vrsqrt.f32 %v584_v18  ;;  %v555_v8 = vmax.f32 %v523_v35, 0.0  ;;  %v554_v48 = vmax.f32 %v522_v40, 0.0  ;;  %v1470_v18 = vld [vmem:[#allocation6_spill] sm:$0xff] }
 0x10b   : > { %v833_v6 = vpop.eup %832  ;;  %v306_v4 = vmul.f32 0.020833334, %v1203_v51  ;;  %711 = vst.msk [vmem:[%s1256_s20 + $0x58] sm:$0xff] %vm180_vm0, %v679_v7  ;;  %v525_v38 = vsub.f32 %v461_v20, %v1264_v39  ;;  %v524_v43 = vsub.f32 %v460_v49, %v1277_v54  ;;  %v308_v54 = vmul.f32 0.020833334, %v1467_v12  ;;  %v1471_v7 = vld [vmem:[#allocation7_spill] sm:$0xff] }
 0x10c   : > { %v835_v62 = vpop.eup %834  ;;  %710 = vst.msk [vmem:[%s1256_s20 + $0x50] sm:$0xff] %vm180_vm0, %v678_v25  ;;  %v643_v14 = vmul.f32 %v833_v6, %v1465_v11  ;;  %v587_v15 = vadd.f32 1e-05, %v555_v8  ;;  %v586_v23 = vadd.f32 1e-05, %v554_v48  ;;  %v419_v55 = vpop.xlane.xlu1 %418  ;;  %v501_v61 = vmul.f32 %v309_v9, %v309_v9 }
 0x10d   : > { %v416_v50 = vpop.xlane.xlu0 %415  ;;  %v642_v51 = vmul.f32 %v835_v62, %v1466_v56  ;;  %v557_v44 = vmax.f32 %v525_v38, 0.0  ;;  %v556_v45 = vmax.f32 %v524_v43, 0.0  ;;  %v463_v52 = vmul.f32 0.020833334, %v419_v55  ;;  %v1472_v38 = vld [vmem:[#allocation8_spill] sm:$0xff] }
 0x10e   : > { %v837_v39 = vpop.eup %836  ;;  %v681_v1 = vmul.f32 %v1246_v57, %v643_v14  ;;  %848 = vrsqrt.f32 %v587_v15  ;;  %v462_v53 = vmul.f32 0.020833334, %v416_v50  ;;  %v498_v31 = vmul.f32 %v306_v4, %v306_v4 }
 0x10f   : > { %v839_v46 = vpop.eup %838  ;;  %v680_v26 = vmul.f32 %v1246_v57, %v642_v51  ;;  %v645_v13 = vmul.f32 %v837_v39, %v1468_v27  ;;  %850 = vrsqrt.f32 %v586_v23  ;;  %v589_v29 = vadd.f32 1e-05, %v557_v44 }
 0x110   : > { %713 = vst.msk [vmem:[%s1256_s20 + $0x68] sm:$0xff] %vm180_vm0, %v681_v1  ;;  %v644_v28 = vmul.f32 %v839_v46, %v1469_v59  ;;  %v588_v60 = vadd.f32 1e-05, %v556_v45  ;;  %v527_v30 = vsub.f32 %v463_v52, %v1289_v10  ;;  %v526_v37 = vsub.f32 %v462_v53, %v1303_v58  ;;  %v425_v24 = vpop.xlane.xlu1 %424  ;;  %v1474_v53 = vld [vmem:[#allocation10_spill] sm:$0xff] }
 0x111   : > { %v422_v2 = vpop.xlane.xlu0 %421  ;;  %712 = vst.msk [vmem:[%s1256_s20 + $0x60] sm:$0xff] %vm180_vm0, %v680_v26  ;;  %v683_v32 = vmul.f32 %v1246_v57, %v645_v13  ;;  %852 = vrsqrt.f32 %v589_v29  ;;  %v465_v33 = vmul.f32 0.020833334, %v425_v24  ;;  %v499_v10 = vmul.f32 %v307_v21, %v307_v21  ;;  %v1475_v13 = vld [vmem:[#allocation11_spill] sm:$0xff] }
 0x112   : > { %v464_v42 = vmul.f32 0.020833334, %v422_v2  ;;  %v682_v16 = vmul.f32 %v1246_v57, %v644_v28  ;;  %854 = vrsqrt.f32 %v588_v60  ;;  %v559_v34 = vmax.f32 %v527_v30, 0.0  ;;  %v1476_v2 = vld [vmem:[#allocation12_spill] sm:$0xff] }
 0x113   : > { %v558_v36 = vmax.f32 %v526_v37, 0.0  ;;  %v841_v47 = vpop.eup %840  ;;  %715 = vst.msk [vmem:[%s1256_s20 + $0x78] sm:$0xff] %vm180_vm0, %v683_v32  ;;  %v529_v58 = vsub.f32 %v465_v33, %v1315_v19  ;;  %v500_v19 = vmul.f32 %v308_v54, %v308_v54 }
 0x114   : > { %v528_v0 = vsub.f32 %v464_v42, %v1321_v63  ;;  %v843_v17 = vpop.eup %842  ;;  %714 = vst.msk [vmem:[%s1256_s20 + $0x70] sm:$0xff] %vm180_vm0, %v682_v16  ;;  %v647_v41 = vmul.f32 %v841_v47, %v1470_v18  ;;  %v591_v35 = vadd.f32 1e-05, %v559_v34  ;;  %v431_v3 = vpop.xlane.xlu1 %430  ;;  %v1477_v42 = vld [vmem:[#allocation13_spill] sm:$0xff] }
 0x115   : > { %v590_v40 = vadd.f32 1e-05, %v558_v36  ;;  %v428_v22 = vpop.xlane.xlu0 %427  ;;  %v646_v20 = vmul.f32 %v843_v17, %v1471_v7  ;;  %v561_v49 = vmax.f32 %v529_v58, 0.0  ;;  %v467_v8 = vmul.f32 0.020833334, %v431_v3  ;;  %v1478_v58 = vld [vmem:[#allocation14_spill] sm:$0xff] }
 0x116   : > { %v560_v25 = vmax.f32 %v528_v0, 0.0  ;;  %v845_v48 = vpop.eup %844  ;;  %v685_v63 = vmul.f32 %v1246_v57, %v647_v41  ;;  %856 = vrsqrt.f32 %v591_v35  ;;  %v466_v6 = vmul.f32 0.020833334, %v428_v22  ;;  %v1479_v17 = vld [vmem:[#allocation15_spill] sm:$0xff]  ;;  %v1480_v3 = vld [vmem:[#allocation16_spill] sm:$0xff]  ;;  %v1481_v7 = vld [vmem:[#allocation17_spill] sm:$0xff] }
 0x117   : > { %v847_v21 = vpop.eup %846  ;;  %v684_v4 = vmul.f32 %v1246_v57, %v646_v20  ;;  %v649_v43 = vmul.f32 %v845_v48, %v1472_v38  ;;  %858 = vrsqrt.f32 %v590_v40  ;;  %v593_v62 = vadd.f32 1e-05, %v561_v49 }
 0x118   : > { %717 = vst.msk [vmem:[%s1256_s20 + $0x88] sm:$0xff] %vm180_vm0, %v685_v63  ;;  %v648_v9 = vmul.f32 %v847_v21, %v1473_v5  ;;  %v592_v11 = vadd.f32 1e-05, %v560_v25  ;;  %v531_v14 = vsub.f32 %v467_v8, %v499_v10  ;;  %v530_v15 = vsub.f32 %v466_v6, %v498_v31  ;;  %v437_v23 = vpop.xlane.xlu1 %436  ;;  %v873_v6 = vld [vmem:[%s915_s15 + $0xe0] sm:$0xff]  ;;  %v874_v5 = vld [vmem:[%s915_s15 + $0xf8] sm:$0xff] }
 0x119   : > { %v434_v55 = vpop.xlane.xlu0 %433  ;;  %716 = vst.msk [vmem:[%s1256_s20 + $0x80] sm:$0xff] %vm180_vm0, %v684_v4  ;;  %v687_v50 = vmul.f32 %v1246_v57, %v649_v43  ;;  %860 = vrsqrt.f32 %v593_v62  ;;  %v469_v56 = vmul.f32 0.020833334, %v437_v23 }
 0x11a   : > { %v468_v51 = vmul.f32 0.020833334, %v434_v55  ;;  %v686_v44 = vmul.f32 %v1246_v57, %v648_v9  ;;  %862 = vrsqrt.f32 %v592_v11  ;;  %v563_v45 = vmax.f32 %v531_v14, 0.0  ;;  %v875_v11 = vld [vmem:[%s915_s15 + $0xf0] sm:$0xff] }
 0x11b   : > { %v562_v52 = vmax.f32 %v530_v15, 0.0  ;;  %v849_v39 = vpop.eup %848  ;;  %719 = vst.msk [vmem:[%s1256_s20 + $0x98] sm:$0xff] %vm180_vm0, %v687_v50  ;;  %v533_v12 = vsub.f32 %v469_v56, %v501_v61 }
 0x11c   : > { %v532_v54 = vsub.f32 %v468_v51, %v500_v19  ;;  %v851_v1 = vpop.eup %850  ;;  %718 = vst.msk [vmem:[%s1256_s20 + $0x90] sm:$0xff] %vm180_vm0, %v686_v44  ;;  %v651_v46 = vmul.f32 %v849_v39, %v1474_v53  ;;  %v595_v26 = vadd.f32 1e-05, %v563_v45  ;;  %v872_v19 = vld [vmem:[%s915_s15 + $0xe8] sm:$0xff] }
 0x11d   : > { %v594_v27 = vadd.f32 1e-05, %v562_v52  ;;  %v650_v29 = vmul.f32 %v851_v1, %v1475_v13  ;;  %v565_v59 = vmax.f32 %v533_v12, 0.0 }
 0x11e   : > { %v564_v28 = vmax.f32 %v532_v54, 0.0  ;;  %v853_v60 = vpop.eup %852  ;;  %v689_v30 = vmul.f32 %v1246_v57, %v651_v46  ;;  %864 = vrsqrt.f32 %v595_v26 }
 0x11f   : > { %v855_v37 = vpop.eup %854  ;;  %v688_v24 = vmul.f32 %v1246_v57, %v650_v29  ;;  %v653_v32 = vmul.f32 %v853_v60, %v1476_v2  ;;  %866 = vrsqrt.f32 %v594_v27  ;;  %v597_v33 = vadd.f32 1e-05, %v565_v59 }
 0x120   : > { %721 = vst.msk [vmem:[%s1256_s20 + $0xa8] sm:$0xff] %vm180_vm0, %v689_v30  ;;  %v652_v16 = vmul.f32 %v855_v37, %v1477_v42  ;;  %v596_v34 = vadd.f32 1e-05, %v564_v28 }
 0x121   : > { %720 = vst.msk [vmem:[%s1256_s20 + $0xa0] sm:$0xff] %vm180_vm0, %v688_v24  ;;  %v691_v36 = vmul.f32 %v1246_v57, %v653_v32  ;;  %868 = vrsqrt.f32 %v597_v33 }
 0x122   : > { %v690_v47 = vmul.f32 %v1246_v57, %v652_v16  ;;  %870 = vrsqrt.f32 %v596_v34 }
 0x123   : > { %v857_v10 = vpop.eup %856  ;;  %723 = vst.msk [vmem:[%s1256_s20 + $0xb8] sm:$0xff] %vm180_vm0, %v691_v36 }
 0x124   : > { %v859_v31 = vpop.eup %858  ;;  %722 = vst.msk [vmem:[%s1256_s20 + $0xb0] sm:$0xff] %vm180_vm0, %v690_v47  ;;  %v655_v0 = vmul.f32 %v857_v10, %v1478_v58 }
 0x125   : > { %v654_v61 = vmul.f32 %v859_v31, %v1479_v17 }
 0x126   : > { %v861_v18 = vpop.eup %860  ;;  %v693_v41 = vmul.f32 %v1246_v57, %v655_v0 }
 0x127   : > { %v863_v35 = vpop.eup %862  ;;  %v692_v40 = vmul.f32 %v1246_v57, %v654_v61  ;;  %v657_v22 = vmul.f32 %v861_v18, %v1480_v3 }
 0x128   : > { %725 = vst.msk [vmem:[%s1256_s20 + $0xc8] sm:$0xff] %vm180_vm0, %v693_v41  ;;  %v656_v20 = vmul.f32 %v863_v35, %v1481_v7 }
 0x129   : > { %724 = vst.msk [vmem:[%s1256_s20 + $0xc0] sm:$0xff] %vm180_vm0, %v692_v40  ;;  %v695_v49 = vmul.f32 %v1246_v57, %v657_v22 }
 0x12a   : > { %v694_v25 = vmul.f32 %v1246_v57, %v656_v20 }
 0x12b   : > { %v865_v8 = vpop.eup %864  ;;  %727 = vst.msk [vmem:[%s1256_s20 + $0xd8] sm:$0xff] %vm180_vm0, %v695_v49 }
 0x12c   : > { %v867_v48 = vpop.eup %866  ;;  %726 = vst.msk [vmem:[%s1256_s20 + $0xd0] sm:$0xff] %vm180_vm0, %v694_v25  ;;  %v659_v63 = vmul.f32 %v872_v19, %v865_v8 }
 0x12d   : > { %v658_v21 = vmul.f32 %v873_v6, %v867_v48 }
 0x12e   : > { %v869_v4 = vpop.eup %868  ;;  %v697_v38 = vmul.f32 %v1246_v57, %v659_v63 }
 0x12f   : > { %v871_v43 = vpop.eup %870  ;;  %v696_v62 = vmul.f32 %v1246_v57, %v658_v21  ;;  %v661_v9 = vmul.f32 %v874_v5, %v869_v4 }
 0x130   : > { %729 = vst.msk [vmem:[%s1256_s20 + $0xe8] sm:$0xff] %vm180_vm0, %v697_v38  ;;  %v660_v14 = vmul.f32 %v875_v11, %v871_v43 }
 0x131   : > { %728 = vst.msk [vmem:[%s1256_s20 + $0xe0] sm:$0xff] %vm180_vm0, %v696_v62  ;;  %v699_v15 = vmul.f32 %v1246_v57, %v661_v9 }
 0x132   : > { %v698_v23 = vmul.f32 %v1246_v57, %v660_v14 }
 0x133   : > { %731 = vst.msk [vmem:[%s1256_s20 + $0xf8] sm:$0xff] %vm180_vm0, %v699_v15 }
 0x134   : > { %730 = vst.msk [vmem:[%s1256_s20 + $0xf0] sm:$0xff] %vm180_vm0, %v698_v23 }
 0x135 PF: > { %s12_s9 = sadd.s32 1, %s882_s9  }
 0x136   : > { %p9_p4 = scmp.ge.s32.totalorder %s12_s9, 4  }
 0x138   :  { %11 = sbr.rel (!%p9_p4) target bundleno = 1 (0x1), region = 58 }

</bundles_post_ra>
